<compile_context>
chip_gen: v7x
topology: tpu7x:2x2x1
jax: 0.10.0
libtpu: 0.0.40
codegen_flags: <defaults>
</compile_context>

<pallas_src>
import functools

import jax
import jax.numpy as jnp
from jax.experimental import pallas as pl
from jax.experimental.pallas import tpu as pltpu


def _round_up(x, m):
    return (x + m - 1) // m * m


def _vmem_capacity_bytes():
    """Physical VMEM per core (generation-aware); conservative fallback."""
    try:
        info = pltpu.get_tpu_info()
        cap = int(getattr(info, "vmem_capacity_bytes", 0))
        if cap > 0:
            return cap
    except Exception:
        pass
    return 64 * 1024 * 1024  # v7x-sized fallback is the safe lower bound


# ----------------------------- Pallas kernels -----------------------------

def _resblock_kernel_identity(x_ref, w0_ref, b0_ref, w1_ref, b1_ref, o_ref,
                              *, compute_dtype):
    """Row tile of the FC ResNet block; identity shortcut (size_in==size_out)."""
    x = x_ref[...].astype(jnp.float32)
    h = jnp.maximum(x, 0.0).astype(compute_dtype)              # relu(x)
    net = jnp.dot(h, w0_ref[...], preferred_element_type=jnp.float32)
    net = jnp.maximum(net + b0_ref[...], 0.0)                  # relu(fc_0(.))
    dx = jnp.dot(net.astype(compute_dtype), w1_ref[...],
                 preferred_element_type=jnp.float32)
    o_ref[...] = (x + dx + b1_ref[...]).astype(o_ref.dtype)


def _resblock_kernel_shortcut(x_ref, w0_ref, b0_ref, w1_ref, b1_ref, ws_ref,
                              o_ref, *, compute_dtype):
    """Row tile; linear shortcut as a second accumulating dot (no concat temp)."""
    x = x_ref[...].astype(jnp.float32)
    h = jnp.maximum(x, 0.0).astype(compute_dtype)
    net = jnp.dot(h, w0_ref[...], preferred_element_type=jnp.float32)
    net = jnp.maximum(net + b0_ref[...], 0.0)
    dx = jnp.dot(net.astype(compute_dtype), w1_ref[...],
                 preferred_element_type=jnp.float32)
    # Shortcut kept in f32 for skip-path precision.
    xs = jnp.dot(x, ws_ref[...], preferred_element_type=jnp.float32)
    o_ref[...] = (xs + dx + b1_ref[...]).astype(o_ref.dtype)


# ------------------------- one-time parameter prep --------------------------

def prepare_params(params, compute_dtype=jnp.float32):
    """Pad the hidden dim to a multiple of 128 and cast the MXU operands once.

    Padding the hidden dim is numerically inert: padded w0 columns / b0 entries
    are zero -> relu gives 0 -> padded w1 rows are zero -> zero contribution.
    """
    size_in, size_h = params["w0"].shape
    size_out = params["w1"].shape[1]
    kh = _round_up(size_h, 128)

    w0 = jnp.pad(params["w0"], ((0, 0), (0, kh - size_h))).astype(compute_dtype)
    b0 = jnp.pad(params["b0"], (0, kh - size_h)).reshape(1, kh).astype(jnp.float32)
    w1 = jnp.pad(params["w1"], ((0, kh - size_h), (0, 0))).astype(compute_dtype)
    b1 = params["b1"].reshape(1, size_out).astype(jnp.float32)

    prepared = {"_prepared": True, "w0": w0, "b0": b0, "w1": w1, "b1": b1,
                "size_in": int(size_in), "size_h": int(size_h),
                "size_out": int(size_out)}
    if "ws" in params:
        prepared["ws"] = params["ws"].astype(jnp.float32)   # f32 skip path
    return prepared


# --------------------------------- wrapper ----------------------------------

def resnet_block_fc_vit(x, params, *, tm=512, compute_dtype=jnp.float32):
    """Applies the FC ResNet block over the last axis of `x`.

    `params` may be a raw dict (w0, b0, w1, b1[, ws]) or a dict returned by
    prepare_params() (preferred: hoists per-call padding/casting).
    """
    if isinstance(params, dict) and params.get("_prepared", False):
        prepared = params
    else:
        prepared = prepare_params(params, compute_dtype)

    size_in = prepared["size_in"]
    size_out = prepared["size_out"]
    kh = prepared["w0"].shape[1]
    has_shortcut = "ws" in prepared
    cdt = prepared["w0"].dtype            # MXU operand dtype (f32 acc always)

    lead_shape = x.shape[:-1]
    assert x.shape[-1] == size_in, "last dim of x must equal size_in"
    M = 1
    for d in lead_shape:
        M *= d
    x2d = x.reshape(M, size_in)           # metadata-only, no copy

    # --- VMEM accounting (weights counted ONCE: Buffered(1)) ----------------
    w_bytes = jnp.dtype(cdt).itemsize
    wts_bytes = ((size_in * kh + kh * size_out) * w_bytes
                 + (size_in * size_out * 4 if has_shortcut else 0)
                 + (kh + size_out) * 4)

    def _vmem_bytes(t):
        act = 2 * t * (size_in + size_out) * 4     # double-buffered x / out
        tmp = t * (size_in + kh + 2 * size_out) * 4  # f32 intermediates
        return act + wts_bytes + tmp

    cap = _vmem_capacity_bytes()
    budget = int(0.75 * cap)              # ~48 MiB on v7x, ~96 MiB on v5e/v6e

    # --- row-tile selection --------------------------------------------------
    tm = max(8, _round_up(min(tm, _round_up(M, 8)), 8))
    while tm > 8 and _vmem_bytes(tm) > budget:
        tm = max(8, _round_up(tm // 2, 8))
    # Keep >=2 grid steps for moderate/large M so v7x's two TensorCores both
    # get work (the "parallel" axis is megacore-shardable).
    if M > 256 and pl.cdiv(M, tm) < 2:
        tm = max(8, _round_up((M + 1) // 2, 8))
    grid = (pl.cdiv(M, tm),)              # ragged last block masked by Pallas

    # --- specs ---------------------------------------------------------------
    once = pl.Buffered(1)                 # constant-index operands: 1 buffer
    x_spec = pl.BlockSpec((tm, size_in), lambda i: (i, 0))
    w0_spec = pl.BlockSpec((size_in, kh), lambda i: (0, 0), pipeline_mode=once)
    b0_spec = pl.BlockSpec((1, kh), lambda i: (0, 0), pipeline_mode=once)
    w1_spec = pl.BlockSpec((kh, size_out), lambda i: (0, 0), pipeline_mode=once)
    b1_spec = pl.BlockSpec((1, size_out), lambda i: (0, 0), pipeline_mode=once)
    out_spec = pl.BlockSpec((tm, size_out), lambda i: (i, 0))

    flops = 2 * M * (size_in * kh + kh * size_out
                     + (size_in * size_out if has_shortcut else 0))
    bytes_accessed = int(M * (size_in + size_out) * 4 + wts_bytes)
    cost = pl.CostEstimate(flops=int(flops), transcendentals=0,
                           bytes_accessed=bytes_accessed)
    vmem_limit = int(min(cap - 8 * 1024 * 1024,          # compiler-scratch reserve
                         max(_vmem_bytes(tm) + 16 * 1024 * 1024,
                             32 * 1024 * 1024)))
    cparams = pltpu.CompilerParams(dimension_semantics=("parallel",),
                                   vmem_limit_bytes=vmem_limit)

    if has_shortcut:
        kernel = functools.partial(_resblock_kernel_shortcut, compute_dtype=cdt)
        ws_spec = pl.BlockSpec((size_in, size_out), lambda i: (0, 0),
                               pipeline_mode=once)
        in_specs = [x_spec, w0_spec, b0_spec, w1_spec, b1_spec, ws_spec]
        operands = (x2d, prepared["w0"], prepared["b0"], prepared["w1"],
                    prepared["b1"], prepared["ws"])
    else:
        kernel = functools.partial(_resblock_kernel_identity, compute_dtype=cdt)
        in_specs = [x_spec, w0_spec, b0_spec, w1_spec, b1_spec]
        operands = (x2d, prepared["w0"], prepared["b0"], prepared["w1"],
                    prepared["b1"])

    out2d = pl.pallas_call(
        kernel,
        out_shape=jax.ShapeDtypeStruct((M, size_out), x.dtype),
        grid_spec=pl.GridSpec(grid=grid, in_specs=in_specs, out_specs=out_spec),
        compiler_params=cparams,
        cost_estimate=cost,
    )(*operands)

    return out2d.reshape(*lead_shape, size_out)


# -------------------------- parameter construction -------------------------

def init_params(key, size_in, size_out=None, size_h=None, init_as_zero=False):
    """Deterministic init mirroring the PyTorch __init__ (kaiming fan_in)."""
    if size_out is None:
        size_out = size_in
    if size_h is None:
        size_h = min(size_in, size_out)

    k0, ks = jax.random.split(key)
    std0 = (2.0 / size_in) ** 0.5        # kaiming_normal_(a=0, mode='fan_in')
    if init_as_zero:
        w0 = jnp.zeros((size_in, size_h), jnp.float32)
    else:
        w0 = jax.random.normal(k0, (size_in, size_h), jnp.float32) * std0
    b0 = jnp.zeros((size_h,), jnp.float32)
    w1 = jnp.zeros((size_h, size_out), jnp.float32)  # fc_1 weight init to zero
    b1 = jnp.zeros((size_out,), jnp.float32)

    params = {"w0": w0, "b0": b0, "w1": w1, "b1": b1}
    if size_in != size_out:
        std_s = (2.0 / size_in) ** 0.5
        params["ws"] = jax.random.normal(ks, (size_in, size_out),
                                         jnp.float32) * std_s
    return params


def reference(x, params):
    """Pure-JAX f32 reference of the forward pass."""
    h = jnp.maximum(x, 0.0)
    net = h @ params["w0"] + params["b0"]
    dx = jnp.maximum(net, 0.0) @ params["w1"] + params["b1"]
    x_s = x @ params["ws"] if "ws" in params else x
    return x_s + dx


# --------------------------------- main -------------------------------------

if __name__ == "__main__":
    key = jax.random.PRNGKey(0)
    kx, kp1, kp2, kw1, kb1, kw2, kx3, kp3, kw3 = jax.random.split(key, 9)

    # Case 1: linear shortcut (size_in != size_out), tiny ViT-style batch.
    B, S = 2, 8
    size_in, size_h, size_out = 32, 32, 64
    x = jax.random.normal(kx, (B, S, size_in), jnp.float32)
    params_s = init_params(kp1, size_in, size_out=size_out, size_h=size_h)
    # PyTorch inits fc_1 weight to zero; override so the fc_0/fc_1 path is
    # actually exercised by the correctness check.
    params_s["w1"] = jax.random.normal(kw1, (size_h, size_out), jnp.float32) * 0.1
    params_s["b1"] = jax.random.normal(kb1, (size_out,), jnp.float32) * 0.1

    out_s = resnet_block_fc_vit(x, params_s)
    jax.block_until_ready(out_s)
    ref_s = reference(x.reshape(-1, size_in), params_s).reshape(B, S, size_out)
    assert out_s.shape == (B, S, size_out)
    assert jnp.allclose(out_s, ref_s, atol=1e-5, rtol=1e-5)

    # Case 2: identity shortcut (size_in == size_out).
    params_i = init_params(kp2, size_in)
    params_i["w1"] = jax.random.normal(kw2, (size_in, size_in), jnp.float32) * 0.1
    out_i = resnet_block_fc_vit(x, params_i)
    jax.block_until_ready(out_i)
    ref_i = reference(x.reshape(-1, size_in), params_i).reshape(B, S, size_in)
    assert out_i.shape == (B, S, size_in)
    assert jnp.allclose(out_i, ref_i, atol=1e-5, rtol=1e-5)

    # Case 3: M not divisible by the row tile (exercises the ragged masked
    # grid step) with bf16 MXU operands, f32 accumulation, f32 shortcut,
    # and the prepare-once / apply-many pattern.
    B3, S3 = 2, 300
    si3, so3 = 64, 96
    x3 = jax.random.normal(kx3, (B3, S3, si3), jnp.float32)
    params_3 = init_params(kp3, si3, size_out=so3)
    params_3["w1"] = jax.random.normal(
        kw3, params_3["w1"].shape, jnp.float32) * 0.1

    prepared_3 = prepare_params(params_3, compute_dtype=jnp.bfloat16)
    out_3 = resnet_block_fc_vit(x3, prepared_3, tm=512)
    jax.block_until_ready(out_3)
    ref_3 = reference(x3.reshape(-1, si3), params_3).reshape(B3, S3, so3)
    assert out_3.shape == (B3, S3, so3)
    assert jnp.allclose(out_3, ref_3, atol=5e-2, rtol=5e-2)

    print("KERNEL_OK")
</pallas_src>

<mosaic_0001>
module attributes {stable_mosaic.version = 11 : i64} {
  func.func @_resblock_kernel_shortcut(%arg0: i32, %arg1: memref<16x32xf32, #tpu.memory_space<vmem>>, %arg2: memref<32x128xf32, #tpu.memory_space<vmem>>, %arg3: memref<1x128xf32, #tpu.memory_space<vmem>>, %arg4: memref<128x64xf32, #tpu.memory_space<vmem>>, %arg5: memref<1x64xf32, #tpu.memory_space<vmem>>, %arg6: memref<32x64xf32, #tpu.memory_space<vmem>>, %arg7: memref<16x64xf32, #tpu.memory_space<vmem>>) attributes {dimension_semantics = [#tpu.dimension_semantics<parallel>], iteration_bounds = array<i64: 1>, scalar_prefetch = 0 : i64, scratch_operands = 0 : i64, tpu.core_type = #tpu.core_type<tc>, window_params = [{transform_indices = @transform_0, window_bounds = array<i64: 16, 32>}, {pipeline_mode = #tpu.pipeline_mode<synchronous>, transform_indices = @transform_1, window_bounds = array<i64: 32, 128>}, {pipeline_mode = #tpu.pipeline_mode<synchronous>, transform_indices = @transform_2, window_bounds = array<i64: 1, 128>}, {pipeline_mode = #tpu.pipeline_mode<synchronous>, transform_indices = @transform_3, window_bounds = array<i64: 128, 64>}, {pipeline_mode = #tpu.pipeline_mode<synchronous>, transform_indices = @transform_4, window_bounds = array<i64: 1, 64>}, {pipeline_mode = #tpu.pipeline_mode<synchronous>, transform_indices = @transform_5, window_bounds = array<i64: 32, 64>}, {transform_indices = @transform_6, window_bounds = array<i64: 16, 64>}]} {
    %c0 = arith.constant 0 : index
    %c0_0 = arith.constant 0 : index
    %0 = vector.load %arg1[%c0, %c0_0] : memref<16x32xf32, #tpu.memory_space<vmem>>, vector<16x32xf32>
    %cst = arith.constant 0.000000e+00 : f32
    %1 = vector.broadcast %cst : f32 to vector<16x32xf32>
    %2 = arith.maximumf %0, %1 : vector<16x32xf32>
    %c0_1 = arith.constant 0 : index
    %c0_2 = arith.constant 0 : index
    %3 = vector.load %arg2[%c0_1, %c0_2] : memref<32x128xf32, #tpu.memory_space<vmem>>, vector<32x128xf32>
    %cst_3 = arith.constant dense<0.000000e+00> : vector<16x128xf32>
    %4 = tpu.matmul %2, %3, %cst_3 {dimension_numbers = #tpu.dot_dimension_numbers<[1], [0], [0], [1], [0, 0, 1, 1], [], []>} : vector<16x32xf32>, vector<32x128xf32>, vector<16x128xf32> -> vector<16x128xf32>
    %c0_4 = arith.constant 0 : index
    %c0_5 = arith.constant 0 : index
    %5 = vector.load %arg3[%c0_4, %c0_5] : memref<1x128xf32, #tpu.memory_space<vmem>>, vector<1x128xf32>
    %6 = vector.broadcast %5 : vector<1x128xf32> to vector<16x128xf32>
    %7 = arith.addf %4, %6 : vector<16x128xf32>
    %cst_6 = arith.constant 0.000000e+00 : f32
    %8 = vector.broadcast %cst_6 : f32 to vector<16x128xf32>
    %9 = arith.maximumf %7, %8 : vector<16x128xf32>
    %c0_7 = arith.constant 0 : index
    %c0_8 = arith.constant 0 : index
    %10 = vector.load %arg4[%c0_7, %c0_8] : memref<128x64xf32, #tpu.memory_space<vmem>>, vector<128x64xf32>
    %cst_9 = arith.constant dense<0.000000e+00> : vector<16x64xf32>
    %11 = tpu.matmul %9, %10, %cst_9 {dimension_numbers = #tpu.dot_dimension_numbers<[1], [0], [0], [1], [0, 0, 1, 1], [], []>} : vector<16x128xf32>, vector<128x64xf32>, vector<16x64xf32> -> vector<16x64xf32>
    %c0_10 = arith.constant 0 : index
    %c0_11 = arith.constant 0 : index
    %12 = vector.load %arg6[%c0_10, %c0_11] : memref<32x64xf32, #tpu.memory_space<vmem>>, vector<32x64xf32>
    %cst_12 = arith.constant dense<0.000000e+00> : vector<16x64xf32>
    %13 = tpu.matmul %0, %12, %cst_12 {dimension_numbers = #tpu.dot_dimension_numbers<[1], [0], [0], [1], [0, 0, 1, 1], [], []>} : vector<16x32xf32>, vector<32x64xf32>, vector<16x64xf32> -> vector<16x64xf32>
    %14 = arith.addf %13, %11 : vector<16x64xf32>
    %c0_13 = arith.constant 0 : index
    %c0_14 = arith.constant 0 : index
    %15 = vector.load %arg5[%c0_13, %c0_14] : memref<1x64xf32, #tpu.memory_space<vmem>>, vector<1x64xf32>
    %16 = vector.broadcast %15 : vector<1x64xf32> to vector<16x64xf32>
    %17 = arith.addf %14, %16 : vector<16x64xf32>
    %c0_15 = arith.constant 0 : index
    %c0_16 = arith.constant 0 : index
    %18 = vector.load %arg7[%c0_15, %c0_16] : memref<16x64xf32, #tpu.memory_space<vmem>>, vector<16x64xf32>
    tpu.vector_store %arg7[%c0_15, %c0_16], %17 {strides = array<i32>} : memref<16x64xf32, #tpu.memory_space<vmem>>, vector<16x64xf32>,
    return
  }
  func.func @transform_0(%arg0: i32) -> (i32, i32) {
    %c0_i32 = arith.constant 0 : i32
    %c0_i32_0 = arith.constant 0 : i32
    return %arg0, %c0_i32 : i32, i32
  }
  func.func @transform_1(%arg0: i32) -> (i32, i32) {
    %c0_i32 = arith.constant 0 : i32
    %c0_i32_0 = arith.constant 0 : i32
    %c0_i32_1 = arith.constant 0 : i32
    return %c0_i32, %c0_i32_0 : i32, i32
  }
  func.func @transform_2(%arg0: i32) -> (i32, i32) {
    %c0_i32 = arith.constant 0 : i32
    %c0_i32_0 = arith.constant 0 : i32
    %c0_i32_1 = arith.constant 0 : i32
    return %c0_i32, %c0_i32_0 : i32, i32
  }
  func.func @transform_3(%arg0: i32) -> (i32, i32) {
    %c0_i32 = arith.constant 0 : i32
    %c0_i32_0 = arith.constant 0 : i32
    %c0_i32_1 = arith.constant 0 : i32
    return %c0_i32, %c0_i32_0 : i32, i32
  }
  func.func @transform_4(%arg0: i32) -> (i32, i32) {
    %c0_i32 = arith.constant 0 : i32
    %c0_i32_0 = arith.constant 0 : i32
    %c0_i32_1 = arith.constant 0 : i32
    return %c0_i32, %c0_i32_0 : i32, i32
  }
  func.func @transform_5(%arg0: i32) -> (i32, i32) {
    %c0_i32 = arith.constant 0 : i32
    %c0_i32_0 = arith.constant 0 : i32
    %c0_i32_1 = arith.constant 0 : i32
    return %c0_i32, %c0_i32_0 : i32, i32
  }
  func.func @transform_6(%arg0: i32) -> (i32, i32) {
    %c0_i32 = arith.constant 0 : i32
    %c0_i32_0 = arith.constant 0 : i32
    return %arg0, %c0_i32 : i32, i32
  }
}

</mosaic_0001>

<bundles_post_ra>
// kernel: tpu_custom_call.1
= control target key start
LH: loop header
LB: loop body
LE: loop exit
PB: predicated region body
PF: predicated region fallthrough
CT: control target
= control target key end

     0   :  { %vm39_vm0 = vcmask 261120   ;;  %s635_s0 = inlined_call_operand.vmem [shape: f32[16,32], index: 0, kind: input, shape index: {}]   ;;  %s636_s1 = inlined_call_operand.vmem [shape: f32[32,128], index: 1, kind: input, shape index: {}]   ;;  %s637_s2 = inlined_call_operand.vmem [shape: f32[1,128], index: 2, kind: input, shape index: {}]   ;;  %s638_s3 = inlined_call_operand.vmem [shape: f32[128,64], index: 3, kind: input, shape index: {}]   ;;  %s639_s4 = inlined_call_operand.vmem [shape: f32[1,64], index: 4, kind: input, shape index: {}]   ;;  %s640_s5 = inlined_call_operand.vmem [shape: f32[32,64], index: 5, kind: input, shape index: {}]   ;;  %s641_s6 = inlined_call_operand.hbm [shape: f32[16,64], index: 6, kind: output, shape index: {}]  }
   0x1   :  { %v28_v0 = vld [vmem:[%s636_s1] sm:$0xff]  ;;  %v29_v1 = vld [vmem:[%s636_s1 + $0x8] sm:$0xff]  ;;  %v30_v2 = vld [vmem:[%s636_s1 + $0x10] sm:$0xff] }
   0x2   :  { %v420_v3 = vpack.c.bf16 %v29_v1, %v28_v0  ;;  %v31_v4 = vld [vmem:[%s636_s1 + $0x18] sm:$0xff]  ;;  %v24_v5 = vld [vmem:[%s635_s0] sm:$0xff]  ;;  %v124_v9 = vld [vmem:[%s638_s3 + $0x8] sm:$0xff] }
   0x3   :  { %v424_v6 = vpack.c.bf16 %v31_v4, %v30_v2  ;;  %v26_v7 = vmax.f32 %v24_v5, 0.0  ;;  %v123_v8 = vld [vmem:[%s638_s3] sm:$0xff]  ;;  %v125_v10 = vld [vmem:[%s638_s3 + $0x10] sm:$0xff]  ;;  %v126_v12 = vld [vmem:[%s638_s3 + $0x18] sm:$0xff] }
   0x4   :  { %421 = vmatprep.subr.bf16.mxu0 %v420_v3  ;;  %v428_v11 = vpack.c.bf16 %v124_v9, %v123_v8  ;;  %v25_v13 = vld [vmem:[%s635_s0 + $0x8] sm:$0xff]  ;;  %v432_v14 = vpack.c.bf16 %v126_v12, %v125_v10  ;;  %v127_v15 = vld [vmem:[%s638_s3 + $0x20] sm:$0xff] }
   0x5   :  { %423 = vmatpush3.bf16.msra.mxu0 %v420_v3  ;;  %371 = vmatprep.mubr.msk.f32.mxu0 %vm39_vm0, %v26_v7  ;;  %v128_v16 = vld [vmem:[%s638_s3 + $0x28] sm:$0xff]  ;;  %v214_v17 = vld [vmem:[%s640_s5] sm:$0xff]  ;;  %v27_v19 = vmax.f32 %v25_v13, 0.0 }
   0x6   :  { %425 = vmatprep.subr.bf16.mxu0 %v424_v6  ;;  %429 = vmatprep.subr.bf16.mxu1 %v428_v11  ;;  %v215_v18 = vld [vmem:[%s640_s5 + $0x8] sm:$0xff]  ;;  %v436_v20 = vpack.c.bf16 %v128_v16, %v127_v15 }
   0x7   :  { %431 = vmatpush3.bf16.msra.mxu1 %v428_v11  ;;  %v460_v21 = vpack.c.bf16 %v215_v18, %v214_v17 }
   0x8   :  { %433 = vmatprep.subr.bf16.mxu1 %v432_v14 }
   0x9   :  { %11 = vsyncpa [#allocation3], 0  ;;  %427 = vmatpush3.bf16.msra.mxu0 %v424_v6  ;;  %v129_v22 = vld [vmem:[%s638_s3 + $0x30] sm:$0xff]  ;;  %v130_v23 = vld [vmem:[%s638_s3 + $0x38] sm:$0xff]  ;;  %s497_s0 = smov [#allocation2]   ;;  %vm308_vm1 = vcmask 523264  }
   0xa   :  { %461 = vmatprep.subr.bf16.mxu0 %v460_v21  ;;  %v440_v24 = vpack.c.bf16 %v130_v23, %v129_v22  ;;  %v131_v25 = vld [vmem:[%s638_s3 + $0x40] sm:$0xff]  ;;  %v132_v26 = vld [vmem:[%s638_s3 + $0x48] sm:$0xff]  ;;  %v133_v28 = vld [vmem:[%s638_s3 + $0x50] sm:$0xff]  ;;  %s316_s24 = sshll.u32 %s497_s0, 4  ;;  %s317_s24 = int_to_ptr.vmem [resolvable:$true] %s316_s24 }
   0xb   :  { %435 = vmatpush3.bf16.msra.mxu1 %v432_v14  ;;  %v444_v27 = vpack.c.bf16 %v132_v26, %v131_v25  ;;  %v134_v29 = vld [vmem:[%s638_s3 + $0x58] sm:$0xff]  ;;  %v135_v31 = vld [vmem:[%s638_s3 + $0x60] sm:$0xff]  ;;  %v136_v32 = vld [vmem:[%s638_s3 + $0x68] sm:$0xff]  ;;  %p478_p1 = scmp.lt.s32.totalorder %s317_s24, %s317_s24 }
   0xc   :  { %372 = vmatmul.mubr.msk.f32.vlgmr.msra.gmra.mrb[0].mxu0 %vm39_vm0, %v27_v19  ;;  %437 = vmatprep.subr.bf16.mxu1 %v436_v20  ;;  %v448_v30 = vpack.c.bf16 %v134_v29, %v133_v28  ;;  %v452_v33 = vpack.c.bf16 %v136_v32, %v135_v31  ;;  %v216_v34 = vld [vmem:[%s640_s5 + $0x10] sm:$0xff]  ;;  %v217_v35 = vld [vmem:[%s640_s5 + $0x18] sm:$0xff]  ;;  %v327_v40 = vld [vmem:[%s637_s2] ss:$0 sm:$0xff]  ;;  %s473_s2 = scalar_lea.vmem %s317_s24, 256 }
   0xd   :  { %463 = vmatpush3.bf16.msra.mxu0 %v460_v21  ;;  %417 = vmatprep.mubr.msk.f32.mxu0 %vm39_vm0, %v24_v5  ;;  %v464_v36 = vpack.c.bf16 %v217_v35, %v216_v34  ;;  %v137_v37 = vld [vmem:[%s638_s3 + $0x70] sm:$0xff]  ;;  %v138_v38 = vld [vmem:[%s638_s3 + $0x78] sm:$0xff]  ;;  %v332_v50 = vld [vmem:[%s639_s4] ss:$0 sm:$0xff]  ;;  %p474_p0 = scmp.ne.s32.totalorder %s317_s24, %s473_s2  ;;  %p479_p2 = scmp.lt.s32.totalorder %s473_s2, %s473_s2 }
   0xe   :  { %v456_v39 = vpack.c.bf16 %v138_v38, %v137_v37 }
   0xf   :  { %439 = vmatpush3.bf16.msra.mxu1 %v436_v20  ;;  %465 = vmatprep.subr.bf16.mxu0 %v464_v36  ;;  %p480_p3 = por %p479_p2, %p478_p1 }
  0x10   :  { %441 = vmatprep.subr.bf16.mxu1 %v440_v24 }
  0x11   :  { %467 = vmatpush3.bf16.msra.mxu0 %v464_v36  ;;  %p481_p4 = pnand %p480_p3, %p474_p0 }
  0x13   :  { %443 = vmatpush3.bf16.msra.mxu1 %v440_v24 }
  0x14   :  { %445 = vmatprep.subr.bf16.mxu1 %v444_v27  ;;  %418 = vmatmul.mubr.msk.f32.vlgmr.msra.gmra.mrb[2].mxu0 %vm39_vm0, %v25_v13 }
  0x17   :  { %447 = vmatpush3.bf16.msra.mxu1 %v444_v27 }
  0x18   :  { %449 = vmatprep.subr.bf16.mxu1 %v448_v30 }
  0x1b   :  { %451 = vmatpush3.bf16.msra.mxu1 %v448_v30 }
  0x1c   :  { %453 = vmatprep.subr.bf16.mxu1 %v452_v33 }
  0x1f   :  { %455 = vmatpush3.bf16.msra.mxu1 %v452_v33 }
  0x20   :  { %457 = vmatprep.subr.bf16.mxu1 %v456_v39 }
  0x23   :  { %459 = vmatpush3.bf16.msra.mxu1 %v456_v39 }
  0xdf   :  { %v373_v41 = vpop.f32.mrb[0].mxu0 }
  0xe0   :  { %v118_v42 = vadd.f32 %v373_v41, %v327_v40  ;;  %v112_v43 = vpop.f32.mrb[1].mxu0 }
  0xe1   :  { %v113_v44 = vadd.f32 %v327_v40, %v112_v43 }
  0xe2   :  { %v122_v46 = vmax.f32 %v118_v42, 0.0 }
  0xe3   :  { %v121_v45 = vmax.f32 %v113_v44, 0.0 }
  0xe5   :  { %406 = vmatprep.mubr.f32.mxu1 %v121_v45 }
  0xe6   :  { %407 = vmatmul.mubr.f32.vlgmr.msra.gmra.mrb[0].mxu1 %v122_v46 }
  0xe7   :  { %v419_v47 = vpop.f32.mrb[2].mxu0 }
  0xe8   :  { %v290_v48 = vpop.f32.mrb[3].mxu0 }
 0x1b9   :  { %v408_v49 = vpop.f32.mrb[0].mxu1 }
 0x1ba   :  { %v296_v51 = vadd.f32 %v419_v47, %v408_v49  ;;  %v205_v52 = vpop.f32.mrb[1].mxu1 }
 0x1bb   :  { %v291_v53 = vadd.f32 %v290_v48, %v205_v52 }
 0x1bc   :  { %v307_v54 = vadd.f32 %v332_v50, %v296_v51 }
 0x1bd   :  { %v306_v55 = vadd.f32 %v332_v50, %v291_v53 }
 0x1be   :  { %310 = vst.msk [vmem:[#allocation2 + $0x8] sm:$0xff] %vm308_vm1, %v307_v54 }
 0x1bf   :  { %309 = vst.msk [vmem:[#allocation2] sm:$0xff] %vm308_vm1, %v306_v55 }
 0x1c0   :  { %484 = shalt.err (!%p481_p4)
}
 0x1c1   :  { %s485_s26 = scalar_lea.hbm %s641_s6, 256 }
 0x1c2   :  { %p486_p5 = scmp.ne.s32.totalorder %s641_s6, %s485_s26  ;;  %p489_p6 = scmp.lt.u32.totalorder %s485_s26, %s641_s6 }
 0x1c4   :  { %p491_p7 = pnand %p489_p6, %p486_p5 }
 0x1c6   :  { %494 = shalt.err (!%p491_p7)
}
 0x1c7   :  { %s498_s7 = smov 128   ;;  %s499_s8 = smov 8  }
 0x1c8   :  { %322 = dma.vmem_to_hbm [thread:$0]  %s317_s24, 256, %s641_s6, [#allocation3], %s498_s7, %s498_s7, %s499_s8  }
 0x1c9   :  { %495 = dma.done.wait [#allocation3], 256  }
 0x1ca   :  { %496 = vsyncadd [#allocation3], 4294967040 }
 0x1cb   :  { %326 = vsyncpa [#allocation3], 1 }

</bundles_post_ra>
